<compile_context>
chip_gen: v5e
topology: v5e:2x2
jax: 0.10.0
libtpu: 0.0.40
codegen_flags: <defaults>
</compile_context>

<pallas_src>
import jax
import jax.numpy as jnp
import numpy as np
from jax.experimental import pallas as pl
from jax.experimental.pallas import tpu as pltpu


def _conv_block_kernel(w_ref, p_ref, alpha_ref, o_ref):
    """Conv(+bias+BN) as one matmul, then PReLU, lane-dense store.

    w_ref:     (Cout, Kp)   folded weights^T (Kp = padded K*K*Cin + 1 bias row)
    p_ref:     (Kp, Mt)     transposed im2col patches for this pixel tile
    alpha_ref: (1,) in SMEM PReLU negative slope (scalar path)
    o_ref:     (Cout, Mt)   output tile; Mt is a multiple of 128 (or full M)
    """
    y = jnp.dot(w_ref[...], p_ref[...], preferred_element_type=jnp.float32)
    a = alpha_ref[0]
    o_ref[...] = jnp.where(y > 0.0, y, a * y).astype(o_ref.dtype)


def _choose_pixel_tiles(m_pixels, kdim_pad, cout):
    """Split the pixel axis: 2-way on v7x (2 TCs/chip), more if VMEM-limited."""
    try:
        kind = jax.devices()[0].device_kind.lower()
    except Exception:
        kind = ""
    cores = 2 if "v7" in kind or "7x" in kind else 1

    # VMEM per pixel column: double-buffered patch tile + output tile (f32).
    bytes_per_px = (2 * kdim_pad + cout) * 4
    budget = 48 * 1024 * 1024           # stay well under the scoped VMEM limit
    tiles = cores
    while tiles < m_pixels and (m_pixels // tiles) * bytes_per_px > budget:
        tiles *= 2
    # Each tile's lane extent must stay a multiple of 128 (full-width stores)
    # and tiles must divide M exactly; otherwise fall back to one fused step.
    if tiles > 1 and (m_pixels % tiles != 0 or (m_pixels // tiles) % 128 != 0):
        tiles = 1
    return tiles


def conv_block_forward(x_nchw, w_oihw, bias, bn_gamma, bn_beta, bn_mean,
                       bn_var, prelu_a, *, eps=1e-5):
    """Forward pass of ConvolutionalBlock (Conv + BN(eval) + PReLU). NCHW."""
    N, Cin, H, W = x_nchw.shape
    Cout, _, K, _ = w_oihw.shape
    p = K // 2
    Ho, Wo = H, W                       # stride = 1, 'same' padding
    M = N * Ho * Wo
    Kdim = K * K * Cin + 1              # +1: constant-one row carries bias + BN shift
    Kp = ((Kdim + 7) // 8) * 8          # sublane-aligned contraction dim

    # ---- plain-JAX glue: transposed im2col ---------------------------------
    x = jnp.transpose(x_nchw, (0, 2, 3, 1)).astype(jnp.float32)        # NHWC
    xp = jnp.pad(x, ((0, 0), (p, p), (p, p), (0, 0)))
    cols = [xp[:, kh:kh + Ho, kw:kw + Wo, :]
            for kh in range(K) for kw in range(K)]                      # (N,Ho,Wo,Cin)
    pat = jnp.concatenate(cols + [jnp.ones((N, Ho, Wo, 1), jnp.float32)],
                          axis=-1)                                      # (N,Ho,Wo,Kdim)
    pat_t = pat.reshape(M, Kdim).T                                      # (Kdim, M)
    if Kp != Kdim:
        pat_t = jnp.pad(pat_t, ((0, Kp - Kdim), (0, 0)))                # (Kp, M)

    # ---- fold conv-bias + eval-mode BN into the weight matrix --------------
    bn_scale = (bn_gamma / jnp.sqrt(bn_var + eps)).astype(jnp.float32)      # (Cout,)
    w_hwio = jnp.transpose(w_oihw, (2, 3, 1, 0)).astype(jnp.float32)        # (K,K,Cin,Cout)
    w_mat = (w_hwio * bn_scale).reshape(K * K * Cin, Cout)
    eff_shift = (bn_beta - bn_mean * bn_scale + bias * bn_scale).astype(jnp.float32)
    w_full = jnp.concatenate([w_mat, eff_shift.reshape(1, Cout)], axis=0)   # (Kdim, Cout)
    if Kp != Kdim:
        w_full = jnp.pad(w_full, ((0, Kp - Kdim), (0, 0)))
    w_full_t = w_full.T                                                     # (Cout, Kp)

    alpha = jnp.asarray(prelu_a, jnp.float32).reshape(1)

    num_tiles = _choose_pixel_tiles(M, Kp, Cout)
    Mt = M // num_tiles

    out = pl.pallas_call(
        _conv_block_kernel,
        out_shape=jax.ShapeDtypeStruct((Cout, M), jnp.float32),
        grid=(num_tiles,),
        in_specs=[
            pl.BlockSpec((Cout, Kp), lambda i: (0, 0)),                 # weights (resident)
            pl.BlockSpec((Kp, Mt), lambda i: (0, i)),                   # patch tile
            pl.BlockSpec(memory_space=pltpu.MemorySpace.SMEM),          # alpha scalar
        ],
        out_specs=pl.BlockSpec((Cout, Mt), lambda i: (0, i)),
        compiler_params=pltpu.CompilerParams(
            dimension_semantics=("parallel",)),
    )(w_full_t, pat_t, alpha)

    # (Cout, N*Ho*Wo) -> NCHW
    return jnp.transpose(out.reshape(Cout, N, Ho, Wo), (1, 0, 2, 3))


def _reference(x_nchw, w_oihw, bias, bn_gamma, bn_beta, bn_mean, bn_var,
               prelu_a, *, eps=1e-5):
    """Plain-JAX reference of the same forward pass (for a sanity check)."""
    K = w_oihw.shape[2]
    p = K // 2
    y = jax.lax.conv_general_dilated(
        x_nchw.astype(jnp.float32), w_oihw.astype(jnp.float32),
        window_strides=(1, 1), padding=((p, p), (p, p)),
        dimension_numbers=("NCHW", "OIHW", "NCHW"))
    y = y + bias.reshape(1, -1, 1, 1)
    scale = bn_gamma / jnp.sqrt(bn_var + eps)
    shift = bn_beta - bn_mean * scale
    y = y * scale.reshape(1, -1, 1, 1) + shift.reshape(1, -1, 1, 1)
    return jnp.where(y > 0, y, prelu_a * y)


if __name__ == "__main__":
    key = jax.random.PRNGKey(0)
    k_x, k_w, k_b = jax.random.split(key, 3)

    N, Cin, Cout, H, W, K = 2, 4, 8, 16, 16, 3

    x = jax.random.normal(k_x, (N, Cin, H, W), dtype=jnp.float32)
    # Deterministic parameter init (shapes match nn.Conv2d / BN / PReLU init).
    w = 0.1 * jax.random.normal(k_w, (Cout, Cin, K, K), dtype=jnp.float32)
    bias = 0.1 * jax.random.normal(k_b, (Cout,), dtype=jnp.float32)
    bn_gamma = jnp.ones((Cout,), jnp.float32)
    bn_beta = jnp.zeros((Cout,), jnp.float32)
    bn_mean = jnp.zeros((Cout,), jnp.float32)   # running stats at init (eval mode)
    bn_var = jnp.ones((Cout,), jnp.float32)
    prelu_a = jnp.float32(0.25)                 # nn.PReLU() default

    fwd = jax.jit(conv_block_forward)
    out = jax.block_until_ready(
        fwd(x, w, bias, bn_gamma, bn_beta, bn_mean, bn_var, prelu_a))

    ref = _reference(x, w, bias, bn_gamma, bn_beta, bn_mean, bn_var, prelu_a)
    np.testing.assert_allclose(np.asarray(out), np.asarray(ref),
                               rtol=2e-2, atol=2e-2)

    print("KERNEL_OK")
</pallas_src>

<mosaic_0001>
module attributes {stable_mosaic.version = 11 : i64} {
  func.func @_conv_block_kernel(%arg0: i32, %arg1: memref<8x40xf32, #tpu.memory_space<vmem>>, %arg2: memref<40x512xf32, #tpu.memory_space<vmem>>, %arg3: memref<1xf32, #tpu.memory_space<smem>>, %arg4: memref<8x512xf32, #tpu.memory_space<vmem>>) attributes {dimension_semantics = [#tpu.dimension_semantics<parallel>], iteration_bounds = array<i64: 1>, scalar_prefetch = 0 : i64, scratch_operands = 0 : i64, tpu.core_type = #tpu.core_type<tc>, window_params = [{pipeline_mode = #tpu.pipeline_mode<synchronous>, transform_indices = @transform_0, window_bounds = array<i64: 8, 40>}, {transform_indices = @transform_1, window_bounds = array<i64: 40, 512>}, {transform_indices = @transform_2, window_bounds = array<i64: 1>}, {transform_indices = @transform_3, window_bounds = array<i64: 8, 512>}]} {
    %c0 = arith.constant 0 : index
    %c0_0 = arith.constant 0 : index
    %0 = vector.load %arg1[%c0, %c0_0] : memref<8x40xf32, #tpu.memory_space<vmem>>, vector<8x40xf32>
    %c0_1 = arith.constant 0 : index
    %c0_2 = arith.constant 0 : index
    %1 = vector.load %arg2[%c0_1, %c0_2] : memref<40x512xf32, #tpu.memory_space<vmem>>, vector<40x512xf32>
    %cst = arith.constant dense<0.000000e+00> : vector<8x512xf32>
    %2 = tpu.matmul %0, %1, %cst {dimension_numbers = #tpu.dot_dimension_numbers<[1], [0], [0], [1], [0, 0, 1, 1], [], []>} : vector<8x40xf32>, vector<40x512xf32>, vector<8x512xf32> -> vector<8x512xf32>
    %c0_3 = arith.constant 0 : index
    %3 = memref.load %arg3[%c0_3] : memref<1xf32, #tpu.memory_space<smem>>
    %cst_4 = arith.constant 0.000000e+00 : f32
    %4 = vector.broadcast %cst_4 : f32 to vector<8x512xf32>
    %5 = arith.cmpf ogt, %2, %4 : vector<8x512xf32>
    %6 = vector.broadcast %3 : f32 to vector<8x512xf32>
    %7 = arith.mulf %6, %2 : vector<8x512xf32>
    %8 = arith.select %5, %2, %7 : vector<8x512xi1>, vector<8x512xf32>
    %c0_5 = arith.constant 0 : index
    %c0_6 = arith.constant 0 : index
    %9 = vector.load %arg4[%c0_5, %c0_6] : memref<8x512xf32, #tpu.memory_space<vmem>>, vector<8x512xf32>
    tpu.vector_store %arg4[%c0_5, %c0_6], %8 {strides = array<i32>} : memref<8x512xf32, #tpu.memory_space<vmem>>, vector<8x512xf32>,
    return
  }
  func.func @transform_0(%arg0: i32) -> (i32, i32) {
    %c0_i32 = arith.constant 0 : i32
    %c0_i32_0 = arith.constant 0 : i32
    %c0_i32_1 = arith.constant 0 : i32
    return %c0_i32, %c0_i32_0 : i32, i32
  }
  func.func @transform_1(%arg0: i32) -> (i32, i32) {
    %c0_i32 = arith.constant 0 : i32
    %c0_i32_0 = arith.constant 0 : i32
    return %c0_i32, %arg0 : i32, i32
  }
  func.func @transform_2(%arg0: i32) -> i32 {
    %c0_i32 = arith.constant 0 : i32
    %c0_i32_0 = arith.constant 0 : i32
    return %c0_i32 : i32
  }
  func.func @transform_3(%arg0: i32) -> (i32, i32) {
    %c0_i32 = arith.constant 0 : i32
    %c0_i32_0 = arith.constant 0 : i32
    return %c0_i32, %arg0 : i32, i32
  }
}

</mosaic_0001>

<bundles_post_ra>
// kernel: conv_block_forward.1
= control target key start
LH: loop header
LB: loop body
LE: loop exit
PB: predicated region body
PF: predicated region fallthrough
CT: control target
= control target key end

     0   :  { %vm36_vm0 = vcmask 326656   ;;  %s244_s1 = inlined_call_operand.vmem [shape: f32[40,512], index: 1, kind: input, shape index: {}]   ;;  %s245_s0 = inlined_call_operand.vmem [shape: f32[8,40], index: 0, kind: input, shape index: {}]   ;;  %s246_s2 = inlined_call_operand.<no memory space> [shape: f32[1], index: 2, kind: input, shape index: {}]   ;;  %s247_s3 = inlined_call_operand.vmem [shape: f32[8,512], index: 3, kind: output, shape index: {}]  }
   0x1   :  { %v34_v0 = vld [vmem:[%s244_s1 + $0x90] sm:$0xff]  ;;  %v35_v1 = vld [vmem:[%s244_s1 + $0x98] sm:$0xff]  ;;  %v32_v4 = vld [vmem:[%s244_s1 + $0x80] sm:$0xff]  ;;  %v125_v21 = vstv %s246_s2 }
   0x2   :  { %v30_v2 = vld [vmem:[%s244_s1 + $0x70] sm:$0xff]  ;;  %91 = vmatpush.msra.mxu2 %v34_v0  ;;  %111 = vmatpush.msra.mxu3 %v35_v1  ;;  %v31_v3 = vld [vmem:[%s244_s1 + $0x78] sm:$0xff]  ;;  %v33_v5 = vld [vmem:[%s244_s1 + $0x88] sm:$0xff] }
   0x3   :  { %51 = vmatpush.msra.mxu0 %v32_v4  ;;  %71 = vmatpush.msra.mxu1 %v33_v5  ;;  %v26_v6 = vld [vmem:[%s244_s1 + $0x50] sm:$0xff]  ;;  %v27_v7 = vld [vmem:[%s244_s1 + $0x58] sm:$0xff]  ;;  %v28_v8 = vld [vmem:[%s244_s1 + $0x60] sm:$0xff] }
   0x4   :  { %92 = vmatpush.msra.mxu2 %v30_v2  ;;  %112 = vmatpush.msra.mxu3 %v31_v3  ;;  %v29_v9 = vld [vmem:[%s244_s1 + $0x68] sm:$0xff]  ;;  %v22_v10 = vld [vmem:[%s244_s1 + $0x30] sm:$0xff]  ;;  %v23_v11 = vld [vmem:[%s244_s1 + $0x38] sm:$0xff] }
   0x5   :  { %52 = vmatpush.msra.mxu0 %v28_v8  ;;  %72 = vmatpush.msra.mxu1 %v29_v9  ;;  %v24_v12 = vld [vmem:[%s244_s1 + $0x40] sm:$0xff]  ;;  %v25_v13 = vld [vmem:[%s244_s1 + $0x48] sm:$0xff]  ;;  %v18_v15 = vld [vmem:[%s244_s1 + $0x10] sm:$0xff] }
   0x6   :  { %93 = vmatpush.msra.mxu2 %v26_v6  ;;  %113 = vmatpush.msra.mxu3 %v27_v7  ;;  %v20_v14 = vld [vmem:[%s244_s1 + $0x20] sm:$0xff]  ;;  %v19_v16 = vld [vmem:[%s244_s1 + $0x18] sm:$0xff]  ;;  %v21_v17 = vld [vmem:[%s244_s1 + $0x28] sm:$0xff] }
   0x7   :  { %53 = vmatpush.msra.mxu0 %v24_v12  ;;  %73 = vmatpush.msra.mxu1 %v25_v13  ;;  %v15_v18 = vld [vmem:[%s245_s0] sm:$0xff]  ;;  %v17_v20 = vld [vmem:[%s244_s1 + $0x8] sm:$0xff] }
   0x8   :  { %94 = vmatpush.msra.mxu2 %v22_v10  ;;  %114 = vmatpush.msra.mxu3 %v23_v11  ;;  %v16_v19 = vld [vmem:[%s244_s1] sm:$0xff] }
   0x9   :  { %54 = vmatpush.msra.mxu0 %v20_v14  ;;  %74 = vmatpush.msra.mxu1 %v21_v17 }
   0xa   :  { %95 = vmatpush.msra.mxu2 %v18_v15  ;;  %115 = vmatpush.msra.mxu3 %v19_v16 }
   0xb   :  { %144 = vmatmul.msk.f32.vlgmr.msra.gmra.mxu2 %vm36_vm0, %v15_v18  ;;  %145 = vmatmul.msk.f32.vlgmr.msra.gmra.mxu3 %vm36_vm0, %v15_v18 }
   0xc   :  { %55 = vmatpush.msra.mxu0 %v16_v19  ;;  %75 = vmatpush.msra.mxu1 %v17_v20 }
   0xd   :  { %142 = vmatmul.msk.f32.vlgmr.msra.gmra.mxu0 %vm36_vm0, %v15_v18  ;;  %143 = vmatmul.msk.f32.vlgmr.msra.gmra.mxu1 %vm36_vm0, %v15_v18 }
  0x8a   :  { %v57_v22 = vpop.f32.mrf.mxu0  ;;  %v77_v23 = vpop.f32.mrf.mxu1 }
  0x8b   :  { %vm121_vm1 = vcmp.gt.f32.partialorder %v57_v22, 0.0  ;;  %v126_v24 = vmul.f32 %v125_v21, %v57_v22  ;;  %vm122_vm2 = vcmp.gt.f32.partialorder %v77_v23, 0.0  ;;  %v127_v25 = vmul.f32 %v125_v21, %v77_v23 }
  0x8d   :  { %v130_v26 = vsel %vm121_vm1, %v57_v22, %v126_v24  ;;  %v131_v27 = vsel %vm122_vm2, %v77_v23, %v127_v25 }
  0x8e   :  { %134 = vst [vmem:[%s247_s3] sm:$0xff] %v130_v26  ;;  %v97_v28 = vpop.f32.mrf.mxu2  ;;  %v117_v29 = vpop.f32.mrf.mxu3 }
  0x8f   :  { %135 = vst [vmem:[%s247_s3 + $0x8] sm:$0xff] %v131_v27  ;;  %vm123_vm3 = vcmp.gt.f32.partialorder %v97_v28, 0.0  ;;  %v128_v30 = vmul.f32 %v125_v21, %v97_v28  ;;  %vm124_vm4 = vcmp.gt.f32.partialorder %v117_v29, 0.0  ;;  %v129_v31 = vmul.f32 %v125_v21, %v117_v29 }
  0x91   :  { %v132_v32 = vsel %vm123_vm3, %v97_v28, %v128_v30  ;;  %v133_v33 = vsel %vm124_vm4, %v117_v29, %v129_v31 }
  0x92   :  { %136 = vst [vmem:[%s247_s3 + $0x10] sm:$0xff] %v132_v32 }
  0x93   :  { %137 = vst [vmem:[%s247_s3 + $0x18] sm:$0xff] %v133_v33 }

</bundles_post_ra>
